<compile_context>
chip_gen: v5e
topology: v5e:2x2
jax: 0.10.0
libtpu: 0.0.40
codegen_flags: <defaults>
</compile_context>

<pallas_src>
import jax
import jax.numpy as jnp
from jax.experimental import pallas as pl
from jax.experimental.pallas import tpu as pltpu


# ----------------------------- Pallas kernel ------------------------------- #

def _add_pe_kernel(x_ref, pe_ref, o_ref):
    """o[b, t, d] = x[b, t, d] + pe[t, d] for one (batch-block, time-tile)."""
    x = x_ref[...].astype(jnp.float32)           # [bb, bt, D]
    pe = pe_ref[...].astype(jnp.float32)         # [bt, D]
    o_ref[...] = (x + pe[None, :, :]).astype(o_ref.dtype)


# ----------------------------- tile selection ------------------------------ #

_VMEM_BUDGET_BYTES = 40 << 20   # double-buffered working-set cap (safe on v7x 64 MiB)
_VMEM_LIMIT_BYTES = 48 << 20    # scoped-VMEM limit handed to the compiler


def _round_up(v, m):
    return ((v + m - 1) // m) * m


def _choose_tiles(B, T, D, x_itemsize, pe_itemsize,
                  budget_bytes=_VMEM_BUDGET_BYTES):
    """Pick (batch_block, time_tile).

    time_tile is always a multiple of 8 sublanes; partial blocks are handled by
    a cdiv grid. Prefers folding the full batch into each block and keeping
    >= 2 time steps so v7x's two TensorCores both get work."""
    t_ceil = _round_up(T, 8)

    # Full batch folded in: bytes per time-row, double-buffered
    # (x tile + out tile in x's dtype, pe tile in pe's dtype).
    per_row_full_b = 2 * (2 * B * D * x_itemsize + D * pe_itemsize)
    bt = (budget_bytes // per_row_full_b) // 8 * 8
    if bt >= 8:
        bb = B
        bt = min(bt, t_ceil)
        # Keep at least 2 time steps when possible (v7x megacore sharding).
        if bt >= t_ceil and t_ceil >= 16:
            bt = _round_up(t_ceil // 2, 8)
        return bb, max(bt, 8)

    # Budget too small for the full batch even at bt=8: tile batch as well.
    bt = 8
    per_batch_elem = 2 * (2 * bt * D * x_itemsize + bt * D * pe_itemsize)
    bb = max(1, min(B, budget_bytes // per_batch_elem))
    return bb, bt


# ------------------------------- forward pass ------------------------------ #

def sinusoidal_positional_encoding_forward(x, pe):
    """x: [B, T, D]; pe: [max_len, D] constant buffer. Returns x + pe[None, :T, :]."""
    B, T, D = x.shape
    assert pe.shape[1] == D and pe.shape[0] >= T, (pe.shape, x.shape)

    bb, bt = _choose_tiles(B, T, D,
                           jnp.dtype(x.dtype).itemsize,
                           jnp.dtype(pe.dtype).itemsize)
    n_t = pl.cdiv(T, bt)
    n_b = pl.cdiv(B, bb)

    return pl.pallas_call(
        _add_pe_kernel,
        out_shape=jax.ShapeDtypeStruct((B, T, D), x.dtype),
        # time = slow axis, batch = fast axis -> pe's block index is constant
        # across consecutive steps, so its tile stays VMEM-resident.
        grid=(n_t, n_b),
        in_specs=[
            pl.BlockSpec((bb, bt, D), lambda t, b: (b, t, 0)),   # x tile (batch folded in)
            pl.BlockSpec((bt, D), lambda t, b: (t, 0)),          # pe tile (no batch dependence)
        ],
        out_specs=pl.BlockSpec((bb, bt, D), lambda t, b: (b, t, 0)),
        compiler_params=pltpu.CompilerParams(
            dimension_semantics=("parallel", "parallel"),
            vmem_limit_bytes=_VMEM_LIMIT_BYTES),
    )(x, pe)


# ------------------------ constant buffer (init-time) ----------------------- #

def make_sinusoidal_pe(d_model, max_len=5000, dtype=jnp.float32):
    """Reproduces SinusoidalPositionalEncoding.__init__ buffer exactly."""
    assert d_model % 2 == 0, "d_model must be even (matches the PyTorch module)"
    positions = jnp.arange(max_len, dtype=jnp.float32)[:, None]          # [L, 1]
    i_vals = jnp.arange(d_model // 2, dtype=jnp.float32)                 # [D/2]
    freqs = jnp.power(jnp.float32(10000.0), -2.0 * i_vals / d_model)     # [D/2]
    angles = positions * freqs                                           # [L, D/2]
    pe_sin = jnp.sin(angles)
    pe_cos = jnp.cos(angles)
    # interleave: even columns = sin, odd columns = cos
    pe = jnp.stack([pe_sin, pe_cos], axis=-1).reshape(max_len, d_model)
    return pe.astype(dtype)


# ----------------------------------- main ----------------------------------- #

if __name__ == "__main__":
    key = jax.random.PRNGKey(0)

    B, T, D = 2, 64, 128          # small shapes; D is lane-dense (multiple of 128)
    max_len = 512

    x = jax.random.normal(key, (B, T, D), jnp.float32)
    pe = make_sinusoidal_pe(D, max_len=max_len)

    out = sinusoidal_positional_encoding_forward(x, pe)
    out = jax.block_until_ready(out)

    # pure-JAX reference: forward(x) = x + pe[:, :T, :]
    ref = x + pe[None, :T, :]

    assert out.shape == (B, T, D), out.shape
    assert bool(jnp.all(jnp.isfinite(out)))
    assert bool(jnp.allclose(out, ref, atol=1e-5, rtol=1e-5)), float(
        jnp.max(jnp.abs(out - ref)))
    print("KERNEL_OK")
</pallas_src>

<mosaic_0001>
module attributes {stable_mosaic.version = 11 : i64} {
  func.func @_add_pe_kernel(%arg0: i32, %arg1: i32, %arg2: memref<2x32x128xf32, #tpu.memory_space<vmem>>, %arg3: memref<32x128xf32, #tpu.memory_space<vmem>>, %arg4: memref<2x32x128xf32, #tpu.memory_space<vmem>>) attributes {dimension_semantics = [#tpu.dimension_semantics<parallel>, #tpu.dimension_semantics<parallel>], iteration_bounds = array<i64: 2, 1>, scalar_prefetch = 0 : i64, scratch_operands = 0 : i64, tpu.core_type = #tpu.core_type<tc>, window_params = [{transform_indices = @transform_0, window_bounds = array<i64: 2, 32, 128>}, {transform_indices = @transform_1, window_bounds = array<i64: 32, 128>}, {transform_indices = @transform_2, window_bounds = array<i64: 2, 32, 128>}]} {
    %c0 = arith.constant 0 : index
    %c0_0 = arith.constant 0 : index
    %c0_1 = arith.constant 0 : index
    %0 = vector.load %arg2[%c0, %c0_0, %c0_1] : memref<2x32x128xf32, #tpu.memory_space<vmem>>, vector<2x32x128xf32>
    %c0_2 = arith.constant 0 : index
    %c0_3 = arith.constant 0 : index
    %1 = vector.load %arg3[%c0_2, %c0_3] : memref<32x128xf32, #tpu.memory_space<vmem>>, vector<32x128xf32>
    %2 = vector.shape_cast %1 : vector<32x128xf32> to vector<1x32x128xf32>
    %3 = vector.broadcast %2 : vector<1x32x128xf32> to vector<2x32x128xf32>
    %4 = arith.addf %0, %3 : vector<2x32x128xf32>
    %c0_4 = arith.constant 0 : index
    %c0_5 = arith.constant 0 : index
    %c0_6 = arith.constant 0 : index
    %5 = vector.load %arg4[%c0_4, %c0_5, %c0_6] : memref<2x32x128xf32, #tpu.memory_space<vmem>>, vector<2x32x128xf32>
    tpu.vector_store %arg4[%c0_4, %c0_5, %c0_6], %4 {strides = array<i32>} : memref<2x32x128xf32, #tpu.memory_space<vmem>>, vector<2x32x128xf32>,
    return
  }
  func.func @transform_0(%arg0: i32, %arg1: i32) -> (i32, i32, i32) {
    %c0_i32 = arith.constant 0 : i32
    %c0_i32_0 = arith.constant 0 : i32
    return %arg1, %arg0, %c0_i32 : i32, i32, i32
  }
  func.func @transform_1(%arg0: i32, %arg1: i32) -> (i32, i32) {
    %c0_i32 = arith.constant 0 : i32
    %c0_i32_0 = arith.constant 0 : i32
    return %arg0, %c0_i32 : i32, i32
  }
  func.func @transform_2(%arg0: i32, %arg1: i32) -> (i32, i32, i32) {
    %c0_i32 = arith.constant 0 : i32
    %c0_i32_0 = arith.constant 0 : i32
    return %arg1, %arg0, %c0_i32 : i32, i32, i32
  }
}

</mosaic_0001>

<bundles_post_ra>
// kernel: tpu_custom_call.1
= control target key start
LH: loop header
LB: loop body
LE: loop exit
PB: predicated region body
PF: predicated region fallthrough
CT: control target
= control target key end

     0   :  { %s824_s0 = inlined_call_operand.hbm [shape: f32[2,64,128], index: 0, kind: input, shape index: {}]   ;;  %s825_s1 = inlined_call_operand.hbm [shape: f32[512,128], index: 1, kind: input, shape index: {}]   ;;  %s826_s2 = inlined_call_operand.hbm [shape: f32[2,64,128], index: 2, kind: output, shape index: {}]  }
   0x1   :  { %827 = sst [smem:[#allocation16_spill]] %s824_s0 }
   0x2   :  { %7 = vsyncpa [#allocation3], 0 }
   0x3   :  { %9 = vsyncpa [#allocation3 + $0x1], 0 }
   0x4   :  { %10 = vsyncpa [#allocation6], 0 }
   0x5   :  { %12 = vsyncpa [#allocation6 + $0x1], 0 }
   0x6   :  { %13 = vsyncpa [#allocation4], 0 }
   0x7   :  { %15 = vsyncpa [#allocation4 + $0x1], 0  ;;  %s664_s9 = smov 0   ;;  %s666_s10 = smov 0  }
   0x8   :  { %s668_s11 = smov 0   ;;  %s670_s12 = smov 0  }
   0x9   :  { %s672_s13 = smov 0   ;;  %s674_s14 = smov 0  }
   0xa LB: > { %s435_s15 = sadd.s32 4294967295, %s632_s14   ;;  %s436_s16 = sadd.s32 4294967294, %s632_s14   ;;  %s632_s14 = sphi %s674_s14, %s21_s14   ;;  %s628_s13 = sphi %s672_s13, %s837_s13   ;;  %s624_s12 = sphi %s670_s12, %s836_s12   ;;  %s620_s11 = sphi %s668_s11, %s835_s11   ;;  %s616_s10 = sphi %s666_s10, %s834_s10   ;;  %s612_s9 = sphi %s664_s9, %s833_s9  }
   0xb   : > { %s33_s17 = sadd.s32 1, %s628_s13  ;;  %s42_s18 = sadd.s32 1, %s620_s11 }
   0xc   : > { %p35_p0 = scmp.ge.s32.totalorder %s33_s17, 2  ;;  %p49_p1 = scmp.ne.s32.totalorder %s620_s11, %s616_s10 }
   0xd   : > { %p50_p2 = scmp.eq.s32.totalorder %s632_s14, 0  ;;  %p55_p3 = scmp.ne.s32.totalorder %s616_s10, %s612_s9 }
   0xe   : > { %s839_s17 = smov (%p35_p0, %s33_s17), 0  ;;  %p56_p5 = scmp.eq.s32.totalorder %s435_s15, 0 }
   0xf   : > { %p705_p4 = por %p50_p2, %p49_p1  ;;  %s38_s20 = ssub.s32 %s628_s13, %s839_s17 }
  0x10   : > { %p107_p6 = scmp.eq.s32.totalorder %s435_s15, 1  ;;  %p40_p7 = scmp.eq.s32.totalorder %s38_s20, 0 }
  0x11   : > { %p711_p8 = por %p56_p5, %p55_p3  ;;  %p113_p10 = scmp.eq.s32.totalorder %s436_s16, 1 }
  0x12   : > { %p715_p9 = por %p107_p6, %p49_p1  ;;  %p438_p12 = scmp.ge.s32.totalorder %s632_s14, 2 }
  0x13   : > { %s720_s23 = scalar_select %p40_p7, %s620_s11, %s42_s18  }
  0x14   : > { %p722_p11 = por %p113_p10, %p55_p3  ;;  %129 = sbr.rel (%p438_p12) target bundleno = 44 (0x2c), region = 16 }
  0x19   : > { %s730_s25 = sand.u32 1, %s620_s11   ;;  %s456_s26 = sshll.u32 %s628_s13, 5 }
  0x1a   : > { %s439_s27 = sshll.u32 %s730_s25, 6  ;;  %s832_s0 = sld [smem:[#allocation16_spill]] }
  0x1b   : > { %s459_s3 = scalar_select %p705_p4, [#allocation0], [#allocation12] }
  0x1c   : > { %s137_s5 = scalar_lea.vmem [#allocation2], %s439_s27  ;;  %s634_s8 = smov 1024  }
  0x1d   : > { %s160_s6 = sshll.u32 %s137_s5, 4  ;;  %s150_s7 = sld [smem:[%s459_s3]]   ;;  %s161_s6 = int_to_ptr.vmem [resolvable:$true] %s160_s6 }
  0x1e   : > { %460 = sst [smem:[#allocation9]] (%p705_p4), %s634_s8  ;;  %s635_s15 = smov 512  }
  0x1f   : > { %461 = sst [smem:[#allocation9 + $0x1]] (%p705_p4), %s635_s15  ;;  %s636_s16 = smov 4  }
  0x20   : > { %s145_s30 = scalar_lea.hbm %s832_s0, %s456_s26  ;;  %462 = sst [smem:[#allocation9 + $0x2]] (%p705_p4), %s636_s16 }
  0x21   : > { %s158_s4 = sshll.u32 %s145_s30, 4  ;;  %s637_s18 = smov 128   ;;  %s159_s4 = int_to_ptr.hbm [resolvable:$true] %s158_s4 }
  0x22   : > { %463 = sst [smem:[#allocation9 + $0x3]] (%p705_p4), %s637_s18  ;;  %s638_s28 = smov 8  }
  0x23   : > { %s442_s20 = sshll.u32 %s150_s7, 26  ;;  %464 = sst [smem:[#allocation9 + $0x4]] (%p705_p4), %s637_s18 }
  0x24   : > { %s443_s27 = sadd.s32 134217728, %s442_s20  ;;  %465 = sst [smem:[#allocation9 + $0x5]] (%p705_p4), %s638_s28 }
  0x25   : > { %s134_s29 = scalar_lea.sflag [#allocation3], %s730_s25  ;;  %s639_s30 = smov [#allocation8]  }
  0x26   : > { %466 = dma.general (%p705_p4), %s159_s4, 1024, %s161_s6, %s134_s29, %s639_s30, [#allocation9], %s443_s27, 0  }
  0x27   : > { %s444_s3 = sshll.u32 %s730_s25, 5  ;;  %s192_s7 = scalar_lea.hbm %s825_s1, %s456_s26 }
  0x28   : > { %s193_s15 = sshll.u32 %s192_s7, 4  ;;  %s187_s16 = scalar_lea.vmem [#allocation5], %s444_s3  ;;  %s194_s15 = int_to_ptr.hbm [resolvable:$true] %s193_s15 }
  0x29   : > { %s195_s18 = sshll.u32 %s187_s16, 4  ;;  %s184_s20 = scalar_lea.sflag [#allocation6], %s730_s25  ;;  %s196_s18 = int_to_ptr.vmem [resolvable:$true] %s195_s18 }
  0x2a   : > { %s640_s28 = smov 128   ;;  %s641_s0 = smov 8  }
  0x2b   : > { %467 = dma.hbm_to_vmem [thread:$0]  (%p705_p4), %s194_s15, 512, %s196_s18, %s184_s20, %s640_s28, %s640_s28, %s641_s0  }
  0x2c PF: > { %p447_p13 = scmp.ge.s32.totalorder %s632_s14, 1  ;;  %p203_p0 = scmp.lt.s32.totalorder %s632_s14, 3 }
  0x2e   : > { %p204_p1 = pnand %p447_p13, %p203_p0 }
  0x2f   : > { %s768_s26 = sand.u32 (!%p204_p1), 1, %s616_s10  }
  0x30   : > { %207 = sbr.rel (%p204_p1) target bundleno = 79 (0x4f), region = 28  ;;  %s448_s4 = sshll.u32 (!%p204_p1), %s768_s26, 6 }
  0x31   : > { %s210_s6 = scalar_lea.sflag (!%p204_p1), [#allocation3], %s768_s26  ;;  %s213_s25 = scalar_lea.vmem (!%p204_p1), [#allocation2], %s448_s4 }
  0x35   : > { %599 = dma.done.wait (%p711_p8), %s210_s6, 1024  }
  0x36   : > { %601 = vsyncadd (%p711_p8), %s210_s6, 4294966272  ;;  %s449_s0 = sshll.u32 %s768_s26, 5  ;;  %s220_s19 = scalar_lea.sflag [#allocation6], %s768_s26 }
  0x37   : > { %s223_s27 = scalar_lea.vmem [#allocation5], %s449_s0 }
  0x38   : > { %603 = dma.done.wait (%p711_p8), %s220_s19, 512  }
  0x39   : > { %605 = vsyncadd (%p711_p8), %s220_s19, 4294966784  ;;  %v255_v0 = vld [vmem:[%s213_s25] sm:$0xff]  ;;  %v256_v2 = vld [vmem:[%s213_s25 + $0x8] sm:$0xff]  ;;  %s249_s29 = scalar_lea.vmem [#allocation7], %s448_s4  ;;  %s284_s21 = scalar_lea.sflag [#allocation4], %s768_s26 }
  0x3a   : > { %v263_v1 = vld [vmem:[%s223_s27] sm:$0xff]  ;;  %v264_v4 = vld [vmem:[%s223_s27 + $0x8] sm:$0xff]  ;;  %v257_v5 = vld [vmem:[%s213_s25 + $0x10] sm:$0xff] }
  0x3b   : > { %v267_v3 = vadd.f32 %v263_v1, %v255_v0  ;;  %v265_v6 = vld [vmem:[%s223_s27 + $0x10] sm:$0xff]  ;;  %v268_v7 = vadd.f32 %v264_v4, %v256_v2  ;;  %v258_v9 = vld [vmem:[%s213_s25 + $0x18] sm:$0xff]  ;;  %v259_v11 = vld [vmem:[%s213_s25 + $0x20] sm:$0xff] }
  0x3c   : > { %v269_v8 = vadd.f32 %v265_v6, %v257_v5  ;;  %v266_v10 = vld [vmem:[%s223_s27 + $0x18] sm:$0xff]  ;;  %v271_v13 = vadd.f32 %v263_v1, %v259_v11  ;;  %v260_v14 = vld [vmem:[%s213_s25 + $0x28] sm:$0xff]  ;;  %v261_v15 = vld [vmem:[%s213_s25 + $0x30] sm:$0xff] }
  0x3d   : > { %275 = vst [vmem:[%s249_s29] sm:$0xff] %v267_v3  ;;  %v270_v12 = vadd.f32 %v266_v10, %v258_v9  ;;  %v262_v16 = vld [vmem:[%s213_s25 + $0x38] sm:$0xff]  ;;  %v272_v17 = vadd.f32 %v264_v4, %v260_v14  ;;  %v273_v18 = vadd.f32 %v265_v6, %v261_v15 }
  0x3e   : > { %276 = vst [vmem:[%s249_s29 + $0x8] sm:$0xff] %v268_v7  ;;  %v274_v19 = vadd.f32 %v266_v10, %v262_v16 }
  0x3f   : > { %277 = vst [vmem:[%s249_s29 + $0x10] sm:$0xff] %v269_v8 }
  0x40   : > { %278 = vst [vmem:[%s249_s29 + $0x18] sm:$0xff] %v270_v12 }
  0x41   : > { %279 = vst [vmem:[%s249_s29 + $0x20] sm:$0xff] %v271_v13 }
  0x42   : > { %280 = vst [vmem:[%s249_s29 + $0x28] sm:$0xff] %v272_v17 }
  0x43   : > { %281 = vst [vmem:[%s249_s29 + $0x30] sm:$0xff] %v273_v18 }
  0x44   : > { %282 = vst [vmem:[%s249_s29 + $0x38] sm:$0xff] %v274_v19 }
  0x45   : > { %s458_s30 = sshll.u32 %s624_s12, 5  ;;  %s309_s3 = sshll.u32 %s249_s29, 4  ;;  %s310_s3 = int_to_ptr.vmem [resolvable:$true] %s309_s3 }
  0x46   : > { %s298_s7 = scalar_lea.hbm %s826_s2, %s458_s30  ;;  %s642_s16 = smov 512  }
  0x47   : > { %s311_s15 = sshll.u32 %s298_s7, 4  ;;  %470 = sst [smem:[#allocation11]] (%p715_p9), %s642_s16  ;;  %s312_s15 = int_to_ptr.hbm [resolvable:$true] %s311_s15 }
  0x48   : > { %s643_s18 = smov 1024   ;;  %s644_s20 = smov 4  }
  0x49   : > { %471 = sst [smem:[#allocation11 + $0x1]] (%p715_p9), %s643_s18  ;;  %s645_s12 = smov 128  }
  0x4a   : > { %472 = sst [smem:[#allocation11 + $0x2]] (%p715_p9), %s644_s20  ;;  %s646_s28 = smov 8  }
  0x4b   : > { %473 = sst [smem:[#allocation11 + $0x3]] (%p715_p9), %s645_s12  ;;  %s647_s26 = smov [#allocation10]  }
  0x4c   : > { %474 = sst [smem:[#allocation11 + $0x4]] (%p715_p9), %s645_s12  ;;  %s648_s4 = smov 0  }
  0x4d   : > { %475 = sst [smem:[#allocation11 + $0x5]] (%p715_p9), %s646_s28 }
  0x4e   : > { %476 = dma.general (%p715_p9), %s310_s3, 1024, %s312_s15, %s284_s21, %s647_s26, [#allocation11], %s648_s4, 0  }
  0x4f PF: > { %s339_s6 = sand.u32 1, %s612_s9   ;;  %p479_p2 = pnand %p438_p12, %p722_p11 }
  0x50   : > { %s340_s25 = scalar_lea.sflag [#allocation4], %s339_s6 }
  0x51   : > { %p480_p3 = pneg %p479_p2 }
  0x53   : > { %607 = dma.done.wait (%p480_p3), %s340_s25, 1024  }
  0x54   : > { %609 = vsyncadd (%p480_p3), %s340_s25, 4294966272  ;;  %s21_s14 = sadd.s32 1, %s632_s14   ;;  %s833_s9 = smov %s616_s10 }
  0x55   : > { %p18_p4 = scmp.ge.s32.totalorder %s21_s14, 4   ;;  %s834_s10 = smov %s620_s11 }
  0x56   : > { %s835_s11 = smov %s720_s23  ;;  %s836_s12 = smov %s628_s13 }
  0x57   : > { %s837_s13 = smov %s839_s17  ;;  %20 = sbr.rel (!%p18_p4) target bundleno = 10 (0xa), region = 96 }
  0x5c   :  { %346 = vsyncpa [#allocation3], 1 }
  0x5d   :  { %348 = vsyncpa [#allocation3 + $0x1], 1 }
  0x5e   :  { %349 = vsyncpa [#allocation6], 1 }
  0x5f   :  { %351 = vsyncpa [#allocation6 + $0x1], 1 }
  0x60   :  { %352 = vsyncpa [#allocation4], 1 }
  0x61   :  { %354 = vsyncpa [#allocation4 + $0x1], 1 }

</bundles_post_ra>
